<compile_context>
chip_gen: v6e
topology: v6e:2x2x1
jax: 0.10.0
libtpu: 0.0.40
codegen_flags: <defaults>
</compile_context>

<pallas_src>
import functools

import jax
import jax.numpy as jnp
from jax.experimental import pallas as pl
from jax.experimental.pallas import tpu as pltpu

# ---------------- config (mirrors args in the PyTorch module) ----------------
NUM_NODES = 64
DIM_FEATURES = 32
DIM_HIDDENS = 128
DIM_EMBS = DIM_HIDDENS        # y[nids] = h requires dim_embs == dim_hiddens
CONV_DEPTH = 2
ACT_TYPE = "relu"

assert DIM_EMBS == DIM_HIDDENS


def _act(h, act_type):
    if act_type == "relu":
        return jnp.maximum(h, 0.0)
    if act_type == "elu":
        # clamp so exp never overflows on the (masked-out) positive branch
        return jnp.where(h > 0, h, jnp.exp(jnp.minimum(h, 0.0)) - 1.0)
    if act_type == "sigmoid":
        return jax.nn.sigmoid(h)
    if act_type == "leaky":
        return jnp.where(h > 0, h, 0.01 * h)
    if act_type == "tanh":
        return jnp.tanh(h)
    raise ValueError(act_type)


def mlp_kernel(sel_ref, x_ref, w0_ref, b0_ref, wc_ref, bc_ref, y_ref, *,
               act_type):
    # sel_ref: (TM, 1) f32 in {0,1}   x_ref: (TM, F) bf16
    # w0_ref:  (F, H) bf16            b0_ref: (1, H) f32
    # wc_ref:  (DEPTH, H, H) bf16     bc_ref: (DEPTH, 1, H) f32
    # y_ref:   (TM, H) out dtype
    depth = wc_ref.shape[0]

    # feat_trans on the MXU: bf16 operands, f32 accumulation.
    h = jnp.dot(x_ref[...], w0_ref[...],
                preferred_element_type=jnp.float32) + b0_ref[...]

    for i in range(depth):                      # small static unrolled chain
        h = _act(h, act_type)                   # f32 VPU/EUP (v5e-safe)
        h = jnp.dot(h.astype(jnp.bfloat16), wc_ref[i],
                    preferred_element_type=jnp.float32) + bc_ref[i]

    # `y = zeros; y[nids] = h`: zero rows not selected by nids.  jnp.where
    # (not multiply) so garbage OOB rows of a partial last tile can't produce
    # 0*Inf/NaN; those rows are discarded on writeback anyway.
    y_ref[...] = jnp.where(sel_ref[...] > 0.0, h, 0.0).astype(y_ref.dtype)


def _round_up(a, b):
    return pl.cdiv(a, b) * b


def _choose_tm(num_nodes):
    """Generation-aware row tile.

    * small N: one grid step (rows rounded to the sublane multiple of 8).
    * large N: 256-row multiples (fills v6e/v7x's 256-wide MXU M dim; also a
      128-multiple, so v5e's 128x128 MXU maps perfectly), capped so the
      parallel grid has >= 2 steps for v7x's two TensorCores, and <= 1024 rows
      so double-buffered tiles stay far inside every generation's VMEM.
    """
    if num_nodes <= 256:
        return _round_up(num_nodes, 8)
    return min(1024, _round_up(pl.cdiv(num_nodes, 2), 256))


@functools.partial(jax.jit, static_argnames=("act_type", "out_dtype"))
def batched_mlp_forward(x, nids, w0, b0, wc, bc, act_type=ACT_TYPE,
                        out_dtype=jnp.float32):
    """x: [num_nodes, F] f32; nids: [n_sel] i32 -> y: [num_nodes, H]."""
    num_nodes, dim_features = x.shape
    dim_hiddens = w0.shape[1]
    conv_depth = wc.shape[0]

    if conv_depth == 0:          # PyTorch module returns the features as-is
        return x

    tm = _choose_tm(num_nodes)
    grid = (pl.cdiv(num_nodes, tm),)

    # Precomputed 0/1 row-selection mask (replaces per-tile compare+reduce and
    # the awkward (1, n_sel) block).  4*TM bytes of DMA per grid step.
    sel = jnp.zeros((num_nodes, 1), jnp.float32).at[nids].set(1.0)

    # bf16 MXU operands: halves x/weight HBM bytes; biases stay f32.
    x_b = x.astype(jnp.bfloat16)
    w0_b = w0.astype(jnp.bfloat16)
    wc_b = wc.astype(jnp.bfloat16)

    flops = 2 * num_nodes * (dim_features * dim_hiddens
                             + conv_depth * dim_hiddens * dim_hiddens)
    transcendentals = (0 if act_type in ("relu", "leaky")
                       else num_nodes * dim_hiddens * conv_depth)
    bytes_accessed = (x_b.size * 2 + sel.size * 4 + w0_b.size * 2
                      + b0.size * 4 + wc_b.size * 2 + bc.size * 4
                      + num_nodes * dim_hiddens * jnp.dtype(out_dtype).itemsize)

    y = pl.pallas_call(
        functools.partial(mlp_kernel, act_type=act_type),
        out_shape=jax.ShapeDtypeStruct((num_nodes, dim_hiddens), out_dtype),
        grid_spec=pltpu.PrefetchScalarGridSpec(
            num_scalar_prefetch=0,
            grid=grid,
            in_specs=[
                pl.BlockSpec((tm, 1), lambda i: (i, 0)),               # mask
                pl.BlockSpec((tm, dim_features), lambda i: (i, 0)),    # x tile
                pl.BlockSpec((dim_features, dim_hiddens), lambda i: (0, 0)),
                pl.BlockSpec((1, dim_hiddens), lambda i: (0, 0)),
                pl.BlockSpec((conv_depth, dim_hiddens, dim_hiddens),
                             lambda i: (0, 0, 0)),
                pl.BlockSpec((conv_depth, 1, dim_hiddens),
                             lambda i: (0, 0, 0)),
            ],
            out_specs=pl.BlockSpec((tm, dim_hiddens), lambda i: (i, 0)),
        ),
        compiler_params=pltpu.CompilerParams(
            dimension_semantics=("parallel",),
            vmem_limit_bytes=32 * 1024 * 1024),
        cost_estimate=pl.CostEstimate(flops=flops,
                                      transcendentals=transcendentals,
                                      bytes_accessed=bytes_accessed),
    )(sel, x_b, w0_b, b0, wc_b, bc)

    return y


def _reference(x, nids, w0, b0, wc, bc, act_type=ACT_TYPE):
    # Mirrors the kernel's bf16-MXU / f32-accumulate math for a fair check.
    h = jnp.dot(x[nids].astype(jnp.bfloat16), w0.astype(jnp.bfloat16),
                preferred_element_type=jnp.float32) + b0[0]
    for i in range(wc.shape[0]):
        h = _act(h, act_type)
        h = jnp.dot(h.astype(jnp.bfloat16), wc[i].astype(jnp.bfloat16),
                    preferred_element_type=jnp.float32) + bc[i, 0]
    y = jnp.zeros((x.shape[0], h.shape[1]), jnp.float32)
    return y.at[nids].set(h)


def _init_linear(key, fan_in, fan_out):
    # deterministic init, same bound convention as torch.nn.Linear
    kw, kb = jax.random.split(key)
    bound = 1.0 / (fan_in ** 0.5)
    w = jax.random.uniform(kw, (fan_in, fan_out), jnp.float32, -bound, bound)
    b = jax.random.uniform(kb, (1, fan_out), jnp.float32, -bound, bound)
    return w, b


def _make_params(key, dim_features, dim_hiddens, conv_depth):
    k_ft, *k_convs = jax.random.split(key, 1 + conv_depth)
    w0, b0 = _init_linear(k_ft, dim_features, dim_hiddens)
    wc_list, bc_list = [], []
    for i in range(conv_depth):
        w, b = _init_linear(k_convs[i], dim_hiddens, dim_hiddens)
        wc_list.append(w)
        bc_list.append(b)
    return w0, b0, jnp.stack(wc_list), jnp.stack(bc_list)


def _check(num_nodes, nid_stride, act_type, key):
    k_x, k_p = jax.random.split(key)
    x = jax.random.normal(k_x, (num_nodes, DIM_FEATURES), jnp.float32)
    nids = jnp.arange(0, num_nodes, nid_stride, dtype=jnp.int32)
    w0, b0, wc, bc = _make_params(k_p, DIM_FEATURES, DIM_HIDDENS, CONV_DEPTH)

    y = batched_mlp_forward(x, nids, w0, b0, wc, bc, act_type=act_type)
    y = jax.block_until_ready(y)

    y_ref = _reference(x, nids, w0, b0, wc, bc, act_type=act_type)
    assert y.shape == (num_nodes, DIM_EMBS)
    assert jnp.allclose(y, y_ref, atol=2e-3, rtol=2e-3), \
        f"mismatch vs JAX ref (N={num_nodes}, act={act_type})"

    # non-selected rows must be exactly zero
    sel_mask = jnp.zeros((num_nodes,), bool).at[nids].set(True)
    assert bool(jnp.all(jnp.where(sel_mask[:, None], True, y == 0.0))), \
        f"non-selected rows not zero (N={num_nodes}, act={act_type})"


if __name__ == "__main__":
    key = jax.random.PRNGKey(0)
    k1, k2 = jax.random.split(key)

    # Shipped config: 64 nodes, 16 selected, single grid step.
    _check(num_nodes=NUM_NODES, nid_stride=4, act_type=ACT_TYPE, key=k1)

    # Multi-tile path: 300 nodes -> tm=256, grid=(2,) with a partial last
    # block; elu exercises the NaN-safe jnp.where masking of OOB rows.
    _check(num_nodes=300, nid_stride=7, act_type="elu", key=k2)

    print("KERNEL_OK")
</pallas_src>

<mosaic_0001>
module attributes {stable_mosaic.version = 11 : i64} {
  func.func @mlp_kernel(%arg0: i32, %arg1: memref<64x1xf32, #tpu.memory_space<vmem>>, %arg2: memref<64x32xbf16, #tpu.memory_space<vmem>>, %arg3: memref<32x128xbf16, #tpu.memory_space<vmem>>, %arg4: memref<1x128xf32, #tpu.memory_space<vmem>>, %arg5: memref<2x128x128xbf16, #tpu.memory_space<vmem>>, %arg6: memref<2x1x128xf32, #tpu.memory_space<vmem>>, %arg7: memref<64x128xf32, #tpu.memory_space<vmem>>) attributes {dimension_semantics = [#tpu.dimension_semantics<parallel>], iteration_bounds = array<i64: 1>, scalar_prefetch = 0 : i64, scratch_operands = 0 : i64, tpu.core_type = #tpu.core_type<tc>, window_params = [{transform_indices = @transform_0, window_bounds = array<i64: 64, 1>}, {transform_indices = @transform_1, window_bounds = array<i64: 64, 32>}, {pipeline_mode = #tpu.pipeline_mode<synchronous>, transform_indices = @transform_2, window_bounds = array<i64: 32, 128>}, {pipeline_mode = #tpu.pipeline_mode<synchronous>, transform_indices = @transform_3, window_bounds = array<i64: 1, 128>}, {pipeline_mode = #tpu.pipeline_mode<synchronous>, transform_indices = @transform_4, window_bounds = array<i64: 2, 128, 128>}, {pipeline_mode = #tpu.pipeline_mode<synchronous>, transform_indices = @transform_5, window_bounds = array<i64: 2, 1, 128>}, {transform_indices = @transform_6, window_bounds = array<i64: 64, 128>}]} {
    %c0 = arith.constant 0 : index
    %c0_0 = arith.constant 0 : index
    %0 = vector.load %arg2[%c0, %c0_0] : memref<64x32xbf16, #tpu.memory_space<vmem>>, vector<64x32xbf16>
    %c0_1 = arith.constant 0 : index
    %c0_2 = arith.constant 0 : index
    %1 = vector.load %arg3[%c0_1, %c0_2] : memref<32x128xbf16, #tpu.memory_space<vmem>>, vector<32x128xbf16>
    %cst = arith.constant dense<0.000000e+00> : vector<64x128xf32>
    %2 = tpu.matmul %0, %1, %cst {dimension_numbers = #tpu.dot_dimension_numbers<[1], [0], [0], [1], [0, 0, 1, 1], [], []>} : vector<64x32xbf16>, vector<32x128xbf16>, vector<64x128xf32> -> vector<64x128xf32>
    %c0_3 = arith.constant 0 : index
    %c0_4 = arith.constant 0 : index
    %3 = vector.load %arg4[%c0_3, %c0_4] : memref<1x128xf32, #tpu.memory_space<vmem>>, vector<1x128xf32>
    %4 = vector.broadcast %3 : vector<1x128xf32> to vector<64x128xf32>
    %5 = arith.addf %2, %4 : vector<64x128xf32>
    %cst_5 = arith.constant 0.000000e+00 : f32
    %6 = vector.broadcast %cst_5 : f32 to vector<64x128xf32>
    %7 = arith.maximumf %5, %6 : vector<64x128xf32>
    %8 = arith.truncf %7 : vector<64x128xf32> to vector<64x128xbf16>
    %c0_6 = arith.constant 0 : index
    %c0_7 = arith.constant 0 : index
    %c0_8 = arith.constant 0 : index
    %9 = vector.load %arg5[%c0_6, %c0_7, %c0_8] : memref<2x128x128xbf16, #tpu.memory_space<vmem>>, vector<1x128x128xbf16>
    %10 = vector.shape_cast %9 : vector<1x128x128xbf16> to vector<128x128xbf16>
    %cst_9 = arith.constant dense<0.000000e+00> : vector<64x128xf32>
    %11 = tpu.matmul %8, %10, %cst_9 {dimension_numbers = #tpu.dot_dimension_numbers<[1], [0], [0], [1], [0, 0, 1, 1], [], []>} : vector<64x128xbf16>, vector<128x128xbf16>, vector<64x128xf32> -> vector<64x128xf32>
    %c0_10 = arith.constant 0 : index
    %c0_11 = arith.constant 0 : index
    %c0_12 = arith.constant 0 : index
    %12 = vector.load %arg6[%c0_10, %c0_11, %c0_12] : memref<2x1x128xf32, #tpu.memory_space<vmem>>, vector<1x1x128xf32>
    %13 = vector.shape_cast %12 : vector<1x1x128xf32> to vector<1x128xf32>
    %14 = vector.broadcast %13 : vector<1x128xf32> to vector<64x128xf32>
    %15 = arith.addf %11, %14 : vector<64x128xf32>
    %cst_13 = arith.constant 0.000000e+00 : f32
    %16 = vector.broadcast %cst_13 : f32 to vector<64x128xf32>
    %17 = arith.maximumf %15, %16 : vector<64x128xf32>
    %18 = arith.truncf %17 : vector<64x128xf32> to vector<64x128xbf16>
    %c1 = arith.constant 1 : index
    %c0_14 = arith.constant 0 : index
    %c0_15 = arith.constant 0 : index
    %19 = vector.load %arg5[%c1, %c0_14, %c0_15] : memref<2x128x128xbf16, #tpu.memory_space<vmem>>, vector<1x128x128xbf16>
    %20 = vector.shape_cast %19 : vector<1x128x128xbf16> to vector<128x128xbf16>
    %cst_16 = arith.constant dense<0.000000e+00> : vector<64x128xf32>
    %21 = tpu.matmul %18, %20, %cst_16 {dimension_numbers = #tpu.dot_dimension_numbers<[1], [0], [0], [1], [0, 0, 1, 1], [], []>} : vector<64x128xbf16>, vector<128x128xbf16>, vector<64x128xf32> -> vector<64x128xf32>
    %c1_17 = arith.constant 1 : index
    %c0_18 = arith.constant 0 : index
    %c0_19 = arith.constant 0 : index
    %22 = vector.load %arg6[%c1_17, %c0_18, %c0_19] : memref<2x1x128xf32, #tpu.memory_space<vmem>>, vector<1x1x128xf32>
    %23 = vector.shape_cast %22 : vector<1x1x128xf32> to vector<1x128xf32>
    %24 = vector.broadcast %23 : vector<1x128xf32> to vector<64x128xf32>
    %25 = arith.addf %21, %24 : vector<64x128xf32>
    %c0_20 = arith.constant 0 : index
    %c0_21 = arith.constant 0 : index
    %26 = vector.load %arg1[%c0_20, %c0_21] : memref<64x1xf32, #tpu.memory_space<vmem>>, vector<64x1xf32>
    %cst_22 = arith.constant 0.000000e+00 : f32
    %27 = vector.broadcast %cst_22 : f32 to vector<64x1xf32>
    %28 = arith.cmpf ogt, %26, %27 : vector<64x1xf32>
    %cst_23 = arith.constant 0.000000e+00 : f32
    %29 = vector.shape_cast %28 : vector<64x1xi1> to vector<64x1xi1>
    %30 = vector.broadcast %29 : vector<64x1xi1> to vector<64x128xi1>
    %31 = vector.broadcast %cst_23 : f32 to vector<64x128xf32>
    %32 = arith.select %30, %25, %31 : vector<64x128xi1>, vector<64x128xf32>
    %c0_24 = arith.constant 0 : index
    %c0_25 = arith.constant 0 : index
    %33 = vector.load %arg7[%c0_24, %c0_25] : memref<64x128xf32, #tpu.memory_space<vmem>>, vector<64x128xf32>
    tpu.vector_store %arg7[%c0_24, %c0_25], %32 {strides = array<i32>} : memref<64x128xf32, #tpu.memory_space<vmem>>, vector<64x128xf32>,
    return
  }
  func.func @transform_0(%arg0: i32) -> (i32, i32) {
    %c0_i32 = arith.constant 0 : i32
    %c0_i32_0 = arith.constant 0 : i32
    return %arg0, %c0_i32 : i32, i32
  }
  func.func @transform_1(%arg0: i32) -> (i32, i32) {
    %c0_i32 = arith.constant 0 : i32
    %c0_i32_0 = arith.constant 0 : i32
    return %arg0, %c0_i32 : i32, i32
  }
  func.func @transform_2(%arg0: i32) -> (i32, i32) {
    %c0_i32 = arith.constant 0 : i32
    %c0_i32_0 = arith.constant 0 : i32
    %c0_i32_1 = arith.constant 0 : i32
    return %c0_i32, %c0_i32_0 : i32, i32
  }
  func.func @transform_3(%arg0: i32) -> (i32, i32) {
    %c0_i32 = arith.constant 0 : i32
    %c0_i32_0 = arith.constant 0 : i32
    %c0_i32_1 = arith.constant 0 : i32
    return %c0_i32, %c0_i32_0 : i32, i32
  }
  func.func @transform_4(%arg0: i32) -> (i32, i32, i32) {
    %c0_i32 = arith.constant 0 : i32
    %c0_i32_0 = arith.constant 0 : i32
    %c0_i32_1 = arith.constant 0 : i32
    %c0_i32_2 = arith.constant 0 : i32
    return %c0_i32, %c0_i32_0, %c0_i32_1 : i32, i32, i32
  }
  func.func @transform_5(%arg0: i32) -> (i32, i32, i32) {
    %c0_i32 = arith.constant 0 : i32
    %c0_i32_0 = arith.constant 0 : i32
    %c0_i32_1 = arith.constant 0 : i32
    %c0_i32_2 = arith.constant 0 : i32
    return %c0_i32, %c0_i32_0, %c0_i32_1 : i32, i32, i32
  }
  func.func @transform_6(%arg0: i32) -> (i32, i32) {
    %c0_i32 = arith.constant 0 : i32
    %c0_i32_0 = arith.constant 0 : i32
    return %arg0, %c0_i32 : i32, i32
  }
}

</mosaic_0001>

<bundles_post_ra>
// kernel: batched_mlp_forward.1
= control target key start
LH: loop header
LB: loop body
LE: loop exit
PB: predicated region body
PF: predicated region fallthrough
CT: control target
= control target key end

     0   :  { %vm76_vm0 = vcmask 261120   ;;  %s871_s0 = inlined_call_operand.vmem [shape: f32[64,1], index: 0, kind: input, shape index: {}]   ;;  %s872_s1 = inlined_call_operand.vmem [shape: bf16[64,32], index: 1, kind: input, shape index: {}]   ;;  %s873_s2 = inlined_call_operand.vmem [shape: bf16[32,128], index: 2, kind: input, shape index: {}]   ;;  %s874_s3 = inlined_call_operand.vmem [shape: f32[1,128], index: 3, kind: input, shape index: {}]   ;;  %s875_s4 = inlined_call_operand.vmem [shape: bf16[2,128,128], index: 4, kind: input, shape index: {}]   ;;  %s876_s5 = inlined_call_operand.vmem [shape: f32[2,1,128], index: 5, kind: input, shape index: {}]   ;;  %s877_s6 = inlined_call_operand.hbm [shape: f32[64,128], index: 6, kind: output, shape index: {}]  }
   0x1   :  { %v682_v0 = vld [vmem:[%s873_s2 + $0x8] sm:$0xff]   ;;  %v683_v1 = vld [vmem:[%s873_s2] sm:$0xff]   ;;  %v686_v4 = vld [vmem:[%s872_s1 + $0x10] sm:$0xff]  }
   0x2   :  { %616 = vmatprep.subr.bf16.mxu0 %v682_v0  ;;  %v684_v2 = vld [vmem:[%s872_s1] sm:$0xff]   ;;  %v685_v3 = vld [vmem:[%s872_s1 + $0x8] sm:$0xff]   ;;  %v688_v5 = vld [vmem:[%s875_s4 + $0x38] sm:$0xff]  }
   0x3   :  { %617 = vmatpush3.bf16.msra.mxu0 %v682_v0  ;;  %620 = vmatprep.mubr.msk.bf16.mxu0 %vm76_vm0, %v684_v2  ;;  %v689_v6 = vld [vmem:[%s875_s4 + $0x30] sm:$0xff]   ;;  %v690_v7 = vld [vmem:[%s875_s4 + $0x28] sm:$0xff]   ;;  %v687_v8 = vld [vmem:[%s872_s1 + $0x18] sm:$0xff]  }
   0x4   :  { %618 = vmatprep.subr.bf16.mxu0 %v683_v1  ;;  %628 = vmatprep.subr.bf16.mxu1 %v688_v5  ;;  %v691_v9 = vld [vmem:[%s875_s4 + $0x20] sm:$0xff]   ;;  %v692_v10 = vld [vmem:[%s875_s4 + $0x18] sm:$0xff]  }
   0x5   :  { %629 = vmatpush3.bf16.msra.mxu1 %v688_v5 }
   0x6   :  { %630 = vmatprep.subr.bf16.mxu1 %v689_v6 }
   0x7   :  { %619 = vmatpush3.bf16.msra.mxu0 %v683_v1 }
   0x9   :  { %631 = vmatpush3.bf16.msra.mxu1 %v689_v6 }
   0xa   :  { %621 = vmatmul.mubr.msk.bf16.vlgmr.msra.gmra.mxu0 %vm76_vm0, %v685_v3  ;;  %632 = vmatprep.subr.bf16.mxu1 %v690_v7 }
   0xb   :  { %624 = vmatprep.mubr.msk.bf16.mxu0 %vm76_vm0, %v686_v4 }
   0xd   :  { %633 = vmatpush3.bf16.msra.mxu1 %v690_v7 }
   0xe   :  { %634 = vmatprep.subr.bf16.mxu1 %v691_v9 }
  0x12   :  { %625 = vmatmul.mubr.msk.bf16.gmra.mxu0 %vm76_vm0, %v687_v8 }
  0x13   :  { %11 = vsyncpa [#allocation3], 0  ;;  %635 = vmatpush3.bf16.msra.mxu1 %v691_v9  ;;  %v693_v11 = vld [vmem:[%s875_s4 + $0x10] sm:$0xff]   ;;  %v694_v12 = vld [vmem:[%s875_s4 + $0x8] sm:$0xff]   ;;  %v726_v54 = vmov 0  }
  0x14   :  { %636 = vmatprep.subr.bf16.mxu1 %v692_v10  ;;  %v695_v13 = vld [vmem:[%s875_s4] sm:$0xff]   ;;  %v696_v14 = vld [vmem:[%s875_s4 + $0x78] sm:$0xff]   ;;  %v697_v15 = vld [vmem:[%s875_s4 + $0x70] sm:$0xff]   ;;  %681 = vset.pattern.permute.xlu1 %v726_v54 }
  0x15   :  { %652 = vmatprep.subr.bf16.mxu0 %v696_v14  ;;  %v698_v16 = vld [vmem:[%s875_s4 + $0x68] sm:$0xff]   ;;  %v699_v17 = vld [vmem:[%s875_s4 + $0x60] sm:$0xff]   ;;  %v700_v18 = vld [vmem:[%s875_s4 + $0x58] sm:$0xff]   ;;  %680 = vset.pattern.permute.xlu0 %v726_v54 }
  0x16   :  { %653 = vmatpush3.bf16.msra.mxu0 %v696_v14  ;;  %v540_v21 = vld [vmem:[%s874_s3] ss:$0 sm:$0xff]  ;;  %v701_v48 = vld [vmem:[%s875_s4 + $0x50] sm:$0xff]   ;;  %v702_v49 = vld [vmem:[%s875_s4 + $0x48] sm:$0xff]  }
  0x17   :  { %637 = vmatpush3.bf16.msra.mxu1 %v692_v10  ;;  %654 = vmatprep.subr.bf16.mxu0 %v697_v15  ;;  %v703_v50 = vld [vmem:[%s875_s4 + $0x40] sm:$0xff]   ;;  %v454_v51 = vld [vmem:[%s871_s0 + $0x10] sm:$0xff]  ;;  %v455_v53 = vld [vmem:[%s871_s0 + $0x18] sm:$0xff] }
  0x18   :  { %638 = vmatprep.subr.bf16.mxu1 %v693_v11  ;;  %v452_v52 = vld [vmem:[%s871_s0] sm:$0xff]  ;;  %vm462_vm1 = vcmp.gt.f32.partialorder %v454_v51, 0.0  ;;  %vm463_vm3 = vcmp.gt.f32.partialorder %v455_v53, 0.0  ;;  %v453_v55 = vld [vmem:[%s871_s0 + $0x8] sm:$0xff]  ;;  %v459_v62 = vld [vmem:[%s871_s0 + $0x38] sm:$0xff] }
  0x19   :  { %vm460_vm2 = vcmp.gt.f32.partialorder %v452_v52, 0.0  ;;  %v470_v56 = vsel %vm462_vm1, 1, %v726_v54  ;;  %vm461_vm4 = vcmp.gt.f32.partialorder %v453_v55, 0.0  ;;  %v457_v58 = vld [vmem:[%s871_s0 + $0x28] sm:$0xff]  ;;  %v456_v59 = vld [vmem:[%s871_s0 + $0x20] sm:$0xff]  ;;  %v471_v60 = vsel %vm463_vm3, 1, %v726_v54 }
  0x1a   :  { %655 = vmatpush3.bf16.msra.mxu0 %v697_v15  ;;  %v468_v57 = vsel %vm460_vm2, 1, %v726_v54  ;;  %483 = vperm.xlu1 %681, %v470_v56   ;;  %v469_v61 = vsel %vm461_vm4, 1, %v726_v54  ;;  %vm465_vm5 = vcmp.gt.f32.partialorder %v457_v58, 0.0  ;;  %vm464_vm6 = vcmp.gt.f32.partialorder %v456_v59, 0.0  ;;  %v458_v63 = vld [vmem:[%s871_s0 + $0x30] sm:$0xff] }
  0x1b   :  { %639 = vmatpush3.bf16.msra.mxu1 %v693_v11  ;;  %656 = vmatprep.subr.bf16.mxu0 %v698_v16  ;;  %v473_v0 = vsel %vm465_vm5, 1, %v726_v54  ;;  %v472_v1 = vsel %vm464_vm6, 1, %v726_v54  ;;  %vm467_vm7 = vcmp.gt.f32.partialorder %v459_v62, 0.0  ;;  %vm466_vm8 = vcmp.gt.f32.partialorder %v458_v63, 0.0  ;;  %v551_v6 = vld [vmem:[%s876_s5] ss:$0 sm:$0xff] }
  0x1c   :  { %640 = vmatprep.subr.bf16.mxu1 %v694_v12  ;;  %477 = vperm.xlu0 %680, %v468_v57   ;;  %v475_v2 = vsel %vm467_vm7, 1, %v726_v54  ;;  %v474_v3 = vsel %vm466_vm8, 1, %v726_v54 }
  0x1e   :  { %657 = vmatpush3.bf16.msra.mxu0 %v698_v16  ;;  %486 = vperm.xlu1 %681, %v471_v60  }
  0x1f   :  { %641 = vmatpush3.bf16.msra.mxu1 %v694_v12  ;;  %658 = vmatprep.subr.bf16.mxu0 %v699_v17 }
  0x20   :  { %642 = vmatprep.subr.bf16.mxu1 %v695_v13  ;;  %480 = vperm.xlu0 %680, %v469_v61  }
  0x22   :  { %659 = vmatpush3.bf16.msra.mxu0 %v699_v17  ;;  %492 = vperm.xlu1 %681, %v473_v0  }
  0x23   :  { %643 = vmatpush3.bf16.msra.mxu1 %v695_v13  ;;  %660 = vmatprep.subr.bf16.mxu0 %v700_v18 }
  0x24   :  { %489 = vperm.xlu0 %680, %v472_v1  }
  0x26   :  { %661 = vmatpush3.bf16.msra.mxu0 %v700_v18  ;;  %498 = vperm.xlu1 %681, %v475_v2  }
  0x27   :  { %662 = vmatprep.subr.bf16.mxu0 %v701_v48 }
  0x28   :  { %495 = vperm.xlu0 %680, %v474_v3  }
  0x2a   :  { %663 = vmatpush3.bf16.msra.mxu0 %v701_v48 }
  0x2b   :  { %664 = vmatprep.subr.bf16.mxu0 %v702_v49 }
  0x2e   :  { %665 = vmatpush3.bf16.msra.mxu0 %v702_v49 }
  0x2f   :  { %666 = vmatprep.subr.bf16.mxu0 %v703_v50 }
  0x32   :  { %667 = vmatpush3.bf16.msra.mxu0 %v703_v50 }
  0xca   :  { %v622_v19 = vpop.f32.mrf.mxu0 }
  0xcb   :  { %v132_v25 = vadd.f32 %v622_v19, %v540_v21 }
  0xcc   :  { %v123_v20 = vpop.f32.mrf.mxu0 }
  0xcd   :  { %v124_v23 = vadd.f32 %v540_v21, %v123_v20  ;;  %v156_v32 = vmax.f32 %v132_v25, 0.0 }
  0xce   :  { %v623_v22 = vpop.f32.mrf.mxu0 }
  0xcf   :  { %v135_v24 = vadd.f32 %v623_v22, %v540_v21  ;;  %v154_v30 = vmax.f32 %v124_v23, 0.0 }
  0xd0   :  { %v126_v26 = vpop.f32.mrf.mxu0 }
  0xd1   :  { %v127_v27 = vadd.f32 %v540_v21, %v126_v26  ;;  %v157_v28 = vmax.f32 %v135_v24, 0.0 }
  0xd2   :  { %v626_v29 = vpop.f32.mrf.mxu0 }
  0xd3   :  { %v155_v31 = vmax.f32 %v127_v27, 0.0  ;;  %v163_v35 = vpack.c.bf16 %v157_v28, %v156_v32  ;;  %v148_v39 = vadd.f32 %v626_v29, %v540_v21 }
  0xd4   :  { %v139_v33 = vpop.f32.mrf.mxu0 }
  0xd5   :  { %v162_v34 = vpack.c.bf16 %v155_v31, %v154_v30  ;;  %v140_v37 = vadd.f32 %v540_v21, %v139_v33  ;;  %v160_v45 = vmax.f32 %v148_v39, 0.0  ;;  %v478_v33 = vpop.permute.xlu0 %477 }
  0xd6   :  { %v627_v36 = vpop.f32.mrf.mxu0  ;;  %vm500_vm10 = vcmp.eq.s32.totalorder %v478_v33, 1 }
  0xd7   :  { %v151_v38 = vadd.f32 %v627_v36, %v540_v21  ;;  %644 = vmatprep.mubr.bf16.mxu1 %v162_v34  ;;  %v158_v43 = vmax.f32 %v140_v37, 0.0  ;;  %v484_v34 = vpop.permute.xlu1 %483  ;;  %v577_v36 = vld [vmem:[%s876_s5 + $0x1] ss:$0 sm:$0xff]  ;;  %s727_s5 = smov [#allocation2]  }
  0xd8   :  { %v142_v40 = vpop.f32.mrf.mxu0  ;;  %645 = vmatmul.mubr.bf16.vlgmr.msra.gmra.mxu1 %v163_v35  ;;  %vm502_vm9 = vcmp.eq.s32.totalorder %v484_v34, 1  ;;  %s529_s2 = sshll.u32 %s727_s5, 4  ;;  %s530_s2 = int_to_ptr.vmem [resolvable:$true] %s529_s2 }
  0xd9   :  { %v143_v41 = vadd.f32 %v540_v21, %v142_v40  ;;  %v161_v42 = vmax.f32 %v151_v38, 0.0  ;;  %v481_v35 = vpop.permute.xlu0 %480  ;;  %s704_s8 = scalar_lea.vmem %s530_s2, 1024  ;;  %p709_p1 = scmp.lt.s32.totalorder %s530_s2, %s530_s2 }
  0xda   :  { %vm501_vm12 = vcmp.eq.s32.totalorder %v481_v35, 1  ;;  %p705_p0 = scmp.ne.s32.totalorder %s530_s2, %s704_s8  ;;  %p710_p2 = scmp.lt.s32.totalorder %s704_s8, %s704_s8 }
  0xdb   :  { %v159_v44 = vmax.f32 %v143_v41, 0.0  ;;  %v165_v47 = vpack.c.bf16 %v161_v42, %v160_v45  ;;  %v487_v37 = vpop.permute.xlu1 %486 }
  0xdc   :  { %vm503_vm11 = vcmp.eq.s32.totalorder %v487_v37, 1  ;;  %p711_p3 = por %p710_p2, %p709_p1 }
  0xdd   :  { %v164_v46 = vpack.c.bf16 %v159_v44, %v158_v43  ;;  %v490_v39 = vpop.permute.xlu0 %489 }
  0xde   :  { %vm504_vm14 = vcmp.eq.s32.totalorder %v490_v39, 1  ;;  %p712_p4 = pnand %p711_p3, %p705_p0 }
  0xdf   :  { %648 = vmatprep.mubr.bf16.mxu1 %v164_v46  ;;  %v493_v45 = vpop.permute.xlu1 %492 }
  0xe0   :  { %649 = vmatmul.mubr.bf16.gmra.mxu1 %v165_v47  ;;  %vm505_vm0 = vcmp.eq.s32.totalorder %v493_v45, 1 }
  0xe1   :  { %v496_v49 = vpop.permute.xlu0 %495 }
  0xe2   :  { %vm506_vm13 = vcmp.eq.s32.totalorder %v496_v49, 1 }
  0xe3   :  { %v499_v56 = vpop.permute.xlu1 %498 }
  0xe4   :  { %vm507_vm15 = vcmp.eq.s32.totalorder %v499_v56, 1 }
 0x198   :  { %v646_v4 = vpop.f32.mrf.mxu1 }
 0x199   :  { %v280_v10 = vadd.f32 %v646_v4, %v551_v6 }
 0x19a   :  { %v271_v5 = vpop.f32.mrf.mxu1 }
 0x19b   :  { %v272_v8 = vadd.f32 %v551_v6, %v271_v5  ;;  %v304_v17 = vmax.f32 %v280_v10, 0.0 }
 0x19c   :  { %v647_v7 = vpop.f32.mrf.mxu1 }
 0x19d   :  { %v283_v9 = vadd.f32 %v647_v7, %v551_v6  ;;  %v302_v15 = vmax.f32 %v272_v8, 0.0 }
 0x19e   :  { %v274_v11 = vpop.f32.mrf.mxu1 }
 0x19f   :  { %v275_v12 = vadd.f32 %v551_v6, %v274_v11  ;;  %v305_v13 = vmax.f32 %v283_v9, 0.0 }
 0x1a0   :  { %v650_v14 = vpop.f32.mrf.mxu1 }
 0x1a1   :  { %v303_v16 = vmax.f32 %v275_v12, 0.0  ;;  %v311_v20 = vpack.c.bf16 %v305_v13, %v304_v17  ;;  %v296_v24 = vadd.f32 %v650_v14, %v551_v6 }
 0x1a2   :  { %v287_v18 = vpop.f32.mrf.mxu1 }
 0x1a3   :  { %v310_v19 = vpack.c.bf16 %v303_v16, %v302_v15  ;;  %v288_v22 = vadd.f32 %v551_v6, %v287_v18  ;;  %v308_v30 = vmax.f32 %v296_v24, 0.0 }
 0x1a4   :  { %v651_v21 = vpop.f32.mrf.mxu1 }
 0x1a5   :  { %v299_v23 = vadd.f32 %v651_v21, %v551_v6  ;;  %668 = vmatprep.mubr.bf16.mxu0 %v310_v19  ;;  %v306_v28 = vmax.f32 %v288_v22, 0.0 }
 0x1a6   :  { %v290_v25 = vpop.f32.mrf.mxu1  ;;  %669 = vmatmul.mubr.bf16.vlgmr.msra.gmra.mxu0 %v311_v20 }
 0x1a7   :  { %v291_v26 = vadd.f32 %v551_v6, %v290_v25  ;;  %v309_v27 = vmax.f32 %v299_v23, 0.0 }
 0x1a9   :  { %v307_v29 = vmax.f32 %v291_v26, 0.0  ;;  %v313_v32 = vpack.c.bf16 %v309_v27, %v308_v30 }
 0x1ab   :  { %v312_v31 = vpack.c.bf16 %v307_v29, %v306_v28 }
 0x1ad   :  { %672 = vmatprep.mubr.bf16.mxu0 %v312_v31 }
 0x1ae   :  { %673 = vmatmul.mubr.bf16.gmra.mxu0 %v313_v32 }
 0x266   :  { %v670_v38 = vpop.f32.mrf.mxu0 }
 0x267   :  { %v430_v40 = vadd.f32 %v670_v38, %v577_v36 }
 0x268   :  { %v421_v41 = vpop.f32.mrf.mxu0 }
 0x269   :  { %v510_v42 = vsel %vm502_vm9, %v430_v40, 0.0  ;;  %v422_v43 = vadd.f32 %v577_v36, %v421_v41 }
 0x26a   :  { %518 = vst [vmem:[#allocation2 + $0x10] sm:$0xff] %v510_v42  ;;  %v671_v44 = vpop.f32.mrf.mxu0 }
 0x26b   :  { %v508_v46 = vsel %vm500_vm10, %v422_v43, 0.0  ;;  %v433_v47 = vadd.f32 %v671_v44, %v577_v36 }
 0x26c   :  { %516 = vst [vmem:[#allocation2] sm:$0xff] %v508_v46  ;;  %v424_v48 = vpop.f32.mrf.mxu0 }
 0x26d   :  { %v511_v50 = vsel %vm503_vm11, %v433_v47, 0.0  ;;  %v425_v51 = vadd.f32 %v577_v36, %v424_v48 }
 0x26e   :  { %519 = vst [vmem:[#allocation2 + $0x18] sm:$0xff] %v511_v50  ;;  %v674_v52 = vpop.f32.mrf.mxu0 }
 0x26f   :  { %v509_v53 = vsel %vm501_vm12, %v425_v51, 0.0  ;;  %v446_v54 = vadd.f32 %v674_v52, %v577_v36 }
 0x270   :  { %517 = vst [vmem:[#allocation2 + $0x8] sm:$0xff] %v509_v53  ;;  %v437_v55 = vpop.f32.mrf.mxu0 }
 0x271   :  { %v514_v57 = vsel %vm506_vm13, %v446_v54, 0.0  ;;  %v438_v58 = vadd.f32 %v577_v36, %v437_v55 }
 0x272   :  { %522 = vst [vmem:[#allocation2 + $0x30] sm:$0xff] %v514_v57  ;;  %v675_v59 = vpop.f32.mrf.mxu0 }
 0x273   :  { %v512_v60 = vsel %vm504_vm14, %v438_v58, 0.0  ;;  %v449_v61 = vadd.f32 %v675_v59, %v577_v36 }
 0x274   :  { %520 = vst [vmem:[#allocation2 + $0x20] sm:$0xff] %v512_v60  ;;  %v440_v62 = vpop.f32.mrf.mxu0 }
 0x275   :  { %v515_v63 = vsel %vm507_vm15, %v449_v61, 0.0  ;;  %v441_v0 = vadd.f32 %v577_v36, %v440_v62 }
 0x276   :  { %523 = vst [vmem:[#allocation2 + $0x38] sm:$0xff] %v515_v63 }
 0x277   :  { %v513_v1 = vsel %vm505_vm0, %v441_v0, 0.0 }
 0x278   :  { %521 = vst [vmem:[#allocation2 + $0x28] sm:$0xff] %v513_v1 }
 0x279   :  { %715 = shalt.err (!%p712_p4)
}
 0x27a   :  { %s728_s9 = smov 128   ;;  %s729_s3 = smov 8  }
 0x27b   :  { %535 = dma.vmem_to_hbm [thread:$0]  %s530_s2, 1024, %s877_s6, [#allocation3], %s728_s9, %s728_s9, %s729_s3  }
 0x27c   :  { %724 = dma.done.wait [#allocation3], 1024  }
 0x27d   :  { %725 = vsyncadd [#allocation3], 4294966272 }
 0x27e   :  { %539 = vsyncpa [#allocation3], 1 }

</bundles_post_ra>
